<compile_context>
chip_gen: v7x
topology: tpu7x:2x2x1
jax: 0.10.0
libtpu: 0.0.40
codegen_flags: <defaults>
</compile_context>

<pallas_src>
import math

import jax
import jax.numpy as jnp
from jax.experimental import pallas as pl
from jax.experimental.pallas import tpu as pltpu


def _heaveside_kernel(x_ref, scale_ref, zp_ref, o_ref):
    # out = scale * (x > zp) as one compare + select; compare in f32 to match
    # torch promotion (f32 parameters against any input dtype).
    x = x_ref[...].astype(jnp.float32)
    o_ref[...] = jnp.where(x > zp_ref[...], scale_ref[...], 0.0).astype(o_ref.dtype)


def _round_up(v, m):
    return ((v + m - 1) // m) * m


def _cdiv(a, b):
    return (a + b - 1) // b


def _choose_view(M, C):
    """Pick a lane-dense 2-D view (rows, lanes, param_reps) of the flat data.

    - C % 128 == 0: keep (M, C) (already lane-dense).
    - C divides 128: fold groups of rows into lane-dense rows of width L
      (multiple of 128 and of C) via a free reshape; params are tiled L//C x.
    - otherwise: full-C blocks (masked stores) — no extra HBM passes.
    """
    if C % 128 == 0:
        return M, C, 1
    if 128 % C == 0:
        total = M * C
        for L in (512, 256, 128):
            if total % L == 0:
                return total // L, L, L // C
    return M, C, 1


def heaveside_forward(x, embed_scale, zero_point, *, target_block_bytes=2 << 20):
    """out = embed_scale * ((x - zero_point) > 0), broadcast over the last dim."""
    orig_shape = x.shape
    C = orig_shape[-1]
    M = math.prod(orig_shape[:-1]) if len(orig_shape) > 1 else 1

    rows, lanes, reps = _choose_view(M, C)
    x2d = x.reshape(rows, lanes)  # row-major view: no data movement

    scale = embed_scale.astype(jnp.float32)
    zp = zero_point.astype(jnp.float32)
    if reps > 1:
        scale = jnp.tile(scale, reps)
        zp = jnp.tile(zp, reps)
    scale2d = scale.reshape(1, lanes)
    zp2d = zp.reshape(1, lanes)

    itemsize = jnp.dtype(x.dtype).itemsize
    sublane = {4: 8, 2: 16, 1: 32}.get(itemsize, 8)

    # Lane-dim blocking: cap lanes per block so a block never blows VMEM even
    # for huge C (v7x: 64 MiB physical / 32 MiB scoped).
    if lanes % 128 == 0:
        cn = min(lanes, 4096)
    else:
        cn = lanes  # full last dim (legal block shape); masked stores
    grid_n = _cdiv(lanes, cn)

    # Row-dim blocking from a VMEM budget (~2 MiB per x block => x + out
    # double-buffered ~8 MiB, under v5e's 16 MiB scoped default).  Keep at
    # least two row programs when possible so both TCs are used on megacore.
    if rows <= sublane:
        tm = rows  # block row extent == full array extent (legal)
    else:
        tm_budget = max(sublane, (target_block_bytes // (cn * itemsize)) // sublane * sublane)
        tm_half = _round_up(_cdiv(rows, 2), sublane)
        tm = min(tm_budget, tm_half)
    grid_m = _cdiv(rows, tm)

    cost = pl.CostEstimate(
        flops=2 * rows * lanes,
        transcendentals=0,
        bytes_accessed=2 * rows * lanes * itemsize + 2 * lanes * 4,
    )

    out2d = pl.pallas_call(
        _heaveside_kernel,
        out_shape=jax.ShapeDtypeStruct((rows, lanes), x.dtype),
        grid_spec=pltpu.PrefetchScalarGridSpec(
            num_scalar_prefetch=0,
            grid=(grid_m, grid_n),
            in_specs=[
                pl.BlockSpec((tm, cn), lambda i, j: (i, j)),   # x tile
                pl.BlockSpec((1, cn), lambda i, j: (0, j)),    # embed_scale (VMEM-resident)
                pl.BlockSpec((1, cn), lambda i, j: (0, j)),    # zero_point  (VMEM-resident)
            ],
            out_specs=pl.BlockSpec((tm, cn), lambda i, j: (i, j)),
        ),
        compiler_params=pltpu.CompilerParams(
            dimension_semantics=("parallel", "parallel"),
        ),
        cost_estimate=cost,
    )(x2d, scale2d, zp2d)

    return out2d.reshape(orig_shape)  # pure view reshape; no slice pass


def simple_param_heaveside_forward(x, embed_scale, zero_point, *, normed=False):
    """Full module forward: optional column normalization, then heaveside."""
    if normed:
        # Fold the normalization into the threshold (std + 1e-5 > 0):
        #   ((x - mean)/(std + 1e-5) - zp) > 0   <=>   x > mean + zp*(std + 1e-5)
        # so the normalized intermediate is never written back to HBM.
        # TODO(synk): M == 1 gives std(ddof=1) = NaN, same as torch.
        shape = x.shape
        x2 = x.reshape(-1, shape[-1]).astype(jnp.float32)
        mean = x2.mean(axis=0)
        std = jnp.std(x2, axis=0, ddof=1)  # torch.std default is unbiased
        zero_point = mean + zero_point.astype(jnp.float32) * (std + 1e-5)
    return heaveside_forward(x, embed_scale, zero_point)


def reference_forward(x, embed_scale, zero_point, *, normed=False):
    if normed:
        shape = x.shape
        x2 = x.reshape(-1, shape[-1])
        x = ((x2 - x2.mean(axis=0)) / (jnp.std(x2, axis=0, ddof=1) + 1e-5)).reshape(shape)
    y = x.astype(jnp.float32) - zero_point.astype(jnp.float32)
    positive = (y > 0).astype(jnp.float32)
    return (embed_scale.astype(jnp.float32) * positive).astype(x.dtype)


if __name__ == "__main__":
    # Small config consistent with the module: batch=2, seq=8, size=32.
    B, S, size = 2, 8, 32
    key = jax.random.PRNGKey(0)
    kx, ks, kz = jax.random.split(key, 3)

    x = jax.random.normal(kx, (B, S, size), dtype=jnp.float32)
    # Module initializes scale=1, zero_point=0; perturb deterministically so the
    # test exercises the per-channel broadcasts.
    embed_scale = jnp.ones((size,), jnp.float32) + 0.1 * jax.random.normal(ks, (size,), dtype=jnp.float32)
    zero_point = 0.1 * jax.random.normal(kz, (size,), dtype=jnp.float32)

    # Default path (normed=False).
    y = jax.block_until_ready(
        simple_param_heaveside_forward(x, embed_scale, zero_point, normed=False))
    y_ref = reference_forward(x, embed_scale, zero_point, normed=False)
    assert y.shape == (B, S, size)
    assert jnp.allclose(y, y_ref, atol=1e-6, rtol=1e-6), "mismatch vs reference (normed=False)"

    # normed=True path (normalization folded into zero_point).
    y_n = jax.block_until_ready(
        simple_param_heaveside_forward(x, embed_scale, zero_point, normed=True))
    y_n_ref = reference_forward(x, embed_scale, zero_point, normed=True)
    assert jnp.allclose(y_n, y_n_ref, atol=1e-5, rtol=1e-5), "mismatch vs reference (normed=True)"

    print("KERNEL_OK")
</pallas_src>

<mosaic_0001>
module attributes {stable_mosaic.version = 11 : i64} {
  func.func @_heaveside_kernel(%arg0: i32, %arg1: i32, %arg2: memref<1x512xf32, #tpu.memory_space<vmem>>, %arg3: memref<1x512xf32, #tpu.memory_space<vmem>>, %arg4: memref<1x512xf32, #tpu.memory_space<vmem>>, %arg5: memref<1x512xf32, #tpu.memory_space<vmem>>) attributes {dimension_semantics = [#tpu.dimension_semantics<parallel>, #tpu.dimension_semantics<parallel>], iteration_bounds = array<i64: 1, 1>, scalar_prefetch = 0 : i64, scratch_operands = 0 : i64, tpu.core_type = #tpu.core_type<tc>, window_params = [{transform_indices = @transform_0, window_bounds = array<i64: 1, 512>}, {transform_indices = @transform_1, window_bounds = array<i64: 1, 512>}, {transform_indices = @transform_2, window_bounds = array<i64: 1, 512>}, {transform_indices = @transform_3, window_bounds = array<i64: 1, 512>}]} {
    %c0 = arith.constant 0 : index
    %c0_0 = arith.constant 0 : index
    %0 = vector.load %arg2[%c0, %c0_0] : memref<1x512xf32, #tpu.memory_space<vmem>>, vector<1x512xf32>
    %c0_1 = arith.constant 0 : index
    %c0_2 = arith.constant 0 : index
    %1 = vector.load %arg4[%c0_1, %c0_2] : memref<1x512xf32, #tpu.memory_space<vmem>>, vector<1x512xf32>
    %2 = arith.cmpf ogt, %0, %1 : vector<1x512xf32>
    %c0_3 = arith.constant 0 : index
    %c0_4 = arith.constant 0 : index
    %3 = vector.load %arg3[%c0_3, %c0_4] : memref<1x512xf32, #tpu.memory_space<vmem>>, vector<1x512xf32>
    %cst = arith.constant 0.000000e+00 : f32
    %4 = vector.broadcast %cst : f32 to vector<1x512xf32>
    %5 = arith.select %2, %3, %4 : vector<1x512xi1>, vector<1x512xf32>
    %c0_5 = arith.constant 0 : index
    %c0_6 = arith.constant 0 : index
    %6 = vector.load %arg5[%c0_5, %c0_6] : memref<1x512xf32, #tpu.memory_space<vmem>>, vector<1x512xf32>
    tpu.vector_store %arg5[%c0_5, %c0_6], %5 {strides = array<i32>} : memref<1x512xf32, #tpu.memory_space<vmem>>, vector<1x512xf32>,
    return
  }
  func.func @transform_0(%arg0: i32, %arg1: i32) -> (i32, i32) {
    %c0_i32 = arith.constant 0 : i32
    return %arg0, %arg1 : i32, i32
  }
  func.func @transform_1(%arg0: i32, %arg1: i32) -> (i32, i32) {
    %c0_i32 = arith.constant 0 : i32
    %c0_i32_0 = arith.constant 0 : i32
    return %c0_i32, %arg1 : i32, i32
  }
  func.func @transform_2(%arg0: i32, %arg1: i32) -> (i32, i32) {
    %c0_i32 = arith.constant 0 : i32
    %c0_i32_0 = arith.constant 0 : i32
    return %c0_i32, %arg1 : i32, i32
  }
  func.func @transform_3(%arg0: i32, %arg1: i32) -> (i32, i32) {
    %c0_i32 = arith.constant 0 : i32
    return %arg0, %arg1 : i32, i32
  }
}

</mosaic_0001>

<bundles_post_ra>
// kernel: tpu_custom_call.1
= control target key start
LH: loop header
LB: loop body
LE: loop exit
PB: predicated region body
PF: predicated region fallthrough
CT: control target
= control target key end

     0   :  { %8 = vsyncpa [#allocation3], 0  ;;  %s202_s0 = inlined_call_operand.hbm [shape: f32[1,512], index: 0, kind: input, shape index: {}]   ;;  %s203_s1 = inlined_call_operand.hbm [shape: f32[1,512], index: 1, kind: input, shape index: {}]   ;;  %s204_s2 = inlined_call_operand.vmem [shape: f32[1,512], index: 2, kind: input, shape index: {}]   ;;  %s205_s3 = inlined_call_operand.hbm [shape: f32[1,512], index: 3, kind: output, shape index: {}]  }
   0x1   :  { %9 = vsyncpa [#allocation6], 0 }
   0x2   :  { %10 = vsyncpa [#allocation4], 0  ;;  %s140_s12 = smov [#allocation2]   ;;  %s141_s14 = smov [#allocation5]  }
   0x3   :  { %s17_s13 = sshll.u32 %s140_s12, 4  ;;  %s27_s15 = sshll.u32 %s141_s14, 4  ;;  %s18_s13 = int_to_ptr.vmem [resolvable:$true] %s17_s13  ;;  %s28_s15 = int_to_ptr.vmem [resolvable:$true] %s27_s15 }
   0x4   :  { %s68_s18 = scalar_lea.hbm %s202_s0, 64 }
   0x5   :  { %p69_p0 = scmp.ne.s32.totalorder %s202_s0, %s68_s18  ;;  %p72_p1 = scmp.lt.u32.totalorder %s68_s18, %s202_s0 }
   0x7   :  { %p74_p2 = pnand %p72_p1, %p69_p0 }
   0x9   :  { %77 = shalt.err (!%p74_p2)
}
   0xa   :  { %s78_s23 = scalar_lea.vmem %s18_s13, 64  ;;  %p83_p4 = scmp.lt.s32.totalorder %s18_s13, %s18_s13 }
   0xb   :  { %p79_p3 = scmp.ne.s32.totalorder %s18_s13, %s78_s23  ;;  %p84_p5 = scmp.lt.s32.totalorder %s78_s23, %s78_s23 }
   0xd   :  { %p85_p6 = por %p84_p5, %p83_p4 }
   0xf   :  { %p86_p7 = pnand %p85_p6, %p79_p3 }
  0x11   :  { %89 = shalt.err (!%p86_p7)
}
  0x12   :  { %20 = dma.hbm_to_vmem [thread:$0]  %s202_s0, 64, %s18_s13, [#allocation3]  }
  0x13   :  { %s90_s28 = scalar_lea.hbm %s203_s1, 64 }
  0x14   :  { %p91_p8 = scmp.ne.s32.totalorder %s203_s1, %s90_s28  ;;  %p94_p9 = scmp.lt.u32.totalorder %s90_s28, %s203_s1 }
  0x16   :  { %p96_p10 = pnand %p94_p9, %p91_p8 }
  0x18   :  { %99 = shalt.err (!%p96_p10)
}
  0x19   :  { %s100_s6 = scalar_lea.vmem %s28_s15, 64  ;;  %p105_p12 = scmp.lt.s32.totalorder %s28_s15, %s28_s15 }
  0x1a   :  { %p101_p11 = scmp.ne.s32.totalorder %s28_s15, %s100_s6  ;;  %p106_p13 = scmp.lt.s32.totalorder %s100_s6, %s100_s6 }
  0x1c   :  { %p107_p0 = por %p106_p13, %p105_p12 }
  0x1e   :  { %p108_p1 = pnand %p107_p0, %p101_p11 }
  0x20   :  { %111 = shalt.err (!%p108_p1)
}
  0x21   :  { %30 = dma.hbm_to_vmem [thread:$0]  %s203_s1, 64, %s28_s15, [#allocation6]  }
  0x22   :  { %134 = dma.done.wait [#allocation3], 64  }
  0x23   :  { %135 = vsyncadd [#allocation3], 4294967232 }
  0x24   :  { %136 = dma.done.wait [#allocation6], 64  }
  0x25   :  { %137 = vsyncadd [#allocation6], 4294967232  ;;  %v44_v0 = vlaneseq  ;;  %s142_s8 = smov [#allocation7]   ;;  %v39_v1 = vld [vmem:[#allocation2] sm:$0xf] }
  0x26   :  { %s55_s9 = sshll.u32 %s142_s8, 4  ;;  %v40_v2 = vld [vmem:[%s204_s2] sm:$0xf]  ;;  %v42_v3 = vld [vmem:[#allocation5] sm:$0xf]  ;;  %s56_s9 = int_to_ptr.vmem [resolvable:$true] %s55_s9 }
  0x27   :  { %vm46_vm0 = vcmp.lt.s32.totalorder %v44_v0, 512  ;;  %vm41_vm1 = vcmp.gt.f32.partialorder %v39_v1, %v40_v2  ;;  %s112_s12 = scalar_lea.vmem %s56_s9, 64  ;;  %p117_p3 = scmp.lt.s32.totalorder %s56_s9, %s56_s9 }
  0x28   :  { %v43_v4 = vsel %vm41_vm1, %v42_v3, 0.0  ;;  %p113_p2 = scmp.ne.s32.totalorder %s56_s9, %s112_s12  ;;  %p118_p4 = scmp.lt.s32.totalorder %s112_s12, %s112_s12 }
  0x29   :  { %48 = vst.msk [vmem:[#allocation7] sm:$0xf] %vm46_vm0, %v43_v4 }
  0x2a   :  { %p119_p5 = por %p118_p4, %p117_p3 }
  0x2c   :  { %p120_p6 = pnand %p119_p5, %p113_p2 }
  0x2e   :  { %123 = shalt.err (!%p120_p6)
}
  0x2f   :  { %s124_s14 = scalar_lea.hbm %s205_s3, 64 }
  0x30   :  { %p125_p7 = scmp.ne.s32.totalorder %s205_s3, %s124_s14  ;;  %p128_p8 = scmp.lt.u32.totalorder %s124_s14, %s205_s3 }
  0x32   :  { %p130_p9 = pnand %p128_p8, %p125_p7 }
  0x34   :  { %133 = shalt.err (!%p130_p9)
}
  0x35   :  { %58 = dma.vmem_to_hbm [thread:$0]  %s56_s9, 64, %s205_s3, [#allocation4]  }
  0x36   :  { %138 = dma.done.wait [#allocation4], 64  }
  0x37   :  { %139 = vsyncadd [#allocation4], 4294967232 }
  0x38   :  { %62 = vsyncpa [#allocation3], 1 }
  0x39   :  { %63 = vsyncpa [#allocation6], 1 }
  0x3a   :  { %64 = vsyncpa [#allocation4], 1 }

</bundles_post_ra>
